<compile_context>
chip_gen: v6e
topology: v6e:2x2x1
jax: 0.10.0
libtpu: 0.0.40
codegen_flags: <defaults>
</compile_context>

<pallas_src>
import functools

import jax
import jax.numpy as jnp
from jax.experimental import pallas as pl
from jax.experimental.pallas import tpu as pltpu


# ----------------------- fused GRU encoder + classifier -----------------------
def fused_gru_classifier_kernel(
        maxlen_ref,                      # SMEM (1,) int32: max(len_x) clamped to T
        x_ref,                           # (T*Bp, D)   time-major rows (step t = rows t*Bp..t*Bp+Bp-1)
        len_ref,                         # (Bp, 1) int32 lengths (padded rows = 0)
        wihr_ref, wihz_ref, wihn_ref,    # (D, H) per-gate input weights (gate order r,z,n)
        br_ref, bz_ref, bn_ref,          # (1, H): br = b_ih_r + b_hh_r, bz likewise, bn = b_ih_n
        whh_ref,                         # (H, 3H) recurrent weights (r,z,n)
        bhhn_ref,                        # (1, H) recurrent n-gate bias (must stay in-loop)
        wcls_ref, bcls_ref,              # (H, C), (1, C) folded classifier
        out_ref,                         # (Bp, C)
        gir_s, giz_s, gin_s,             # scratch: (T*Bp, H) each
        *, fuse_hh):
    Bp = len_ref.shape[0]
    H = whh_ref.shape[0]

    # ---- hoisted input projection: one MXU matmul per gate, straight into scratch
    x = x_ref[...]
    gir_s[...] = (jnp.dot(x, wihr_ref[...], preferred_element_type=jnp.float32)
                  + br_ref[...]).astype(gir_s.dtype)
    giz_s[...] = (jnp.dot(x, wihz_ref[...], preferred_element_type=jnp.float32)
                  + bz_ref[...]).astype(giz_s.dtype)
    gin_s[...] = (jnp.dot(x, wihn_ref[...], preferred_element_type=jnp.float32)
                  + bn_ref[...]).astype(gin_s.dtype)

    # ---- hoisted recurrent operands (loaded / sliced once, reused every step) ----
    bhh_n = bhhn_ref[...].astype(jnp.float32)
    len_vec = len_ref[...]                               # (Bp, 1) int32
    if fuse_hh:
        whh = whh_ref[...]                               # one (H, 3H) matmul per step
    else:
        whh_all = whh_ref[...]                           # one-time slices, outside the loop
        whh_r = whh_all[:, 0:H]
        whh_z = whh_all[:, H:2 * H]
        whh_n = whh_all[:, 2 * H:3 * H]

    def step(t, h):
        row = pl.multiple_of(t * Bp, Bp)                 # Bp is a sublane multiple -> aligned loads
        gi_r = gir_s[pl.ds(row, Bp), :].astype(jnp.float32)
        gi_z = giz_s[pl.ds(row, Bp), :].astype(jnp.float32)
        gi_n = gin_s[pl.ds(row, Bp), :].astype(jnp.float32)

        hm = h.astype(whh_ref.dtype)
        if fuse_hh:
            gh = jnp.dot(hm, whh, preferred_element_type=jnp.float32)   # (Bp, 3H)
            gh_r = gh[:, 0:H]
            gh_z = gh[:, H:2 * H]
            gh_n = gh[:, 2 * H:3 * H]
        else:
            gh_r = jnp.dot(hm, whh_r, preferred_element_type=jnp.float32)
            gh_z = jnp.dot(hm, whh_z, preferred_element_type=jnp.float32)
            gh_n = jnp.dot(hm, whh_n, preferred_element_type=jnp.float32)

        r = jax.nn.sigmoid(gi_r + gh_r)                  # r/z recurrent biases already folded into gi
        z = jax.nn.sigmoid(gi_z + gh_z)
        n = jnp.tanh(gi_n + r * (gh_n + bhh_n))
        h_new = (1.0 - z) * n + z * h
        # pack_padded_sequence semantics: freeze hidden state once t >= len_x[b]
        return jnp.where(t < len_vec, h_new, h)

    h0 = jnp.zeros((Bp, H), jnp.float32)
    # dynamic trip count: skip timesteps that are pure padding for every sequence
    h_final = jax.lax.fori_loop(0, maxlen_ref[0], step, h0)

    # ---- folded classifier (Linear->Linear, no activation) + softmax, all f32 ----
    logits = jnp.dot(h_final, wcls_ref[...],
                     preferred_element_type=jnp.float32) + bcls_ref[...]
    m = jnp.max(logits, axis=-1, keepdims=True)
    e = jnp.exp(logits - m)
    out_ref[...] = e / jnp.sum(e, axis=-1, keepdims=True)


# ---------------------------------- model --------------------------------------
@functools.partial(jax.jit, static_argnames=("use_bf16",))
def model_forward(x, len_x, params, use_bf16=False):
    """x: (B, T) int32 token ids, len_x: (B,) int32 lengths."""
    # embedding lookups (gather glue in plain JAX)
    emb = jnp.take(params["embedding"], x, axis=0)           # (B, T, E)
    aff = jnp.take(params["affect_embedding"], x, axis=0)    # (B, T, A)
    embed_x = jnp.concatenate([emb, aff], axis=2)            # (B, T, D)
    embed_x = jnp.transpose(embed_x, (1, 0, 2))              # (T, B, D) time-major

    T, B, D = embed_x.shape
    H = params["w_hh"].shape[0]
    C = params["w2"].shape[1]

    in_dtype = jnp.bfloat16 if use_bf16 else jnp.float32
    sub = 16 if use_bf16 else 8                               # sublane packing of the scratch dtype
    B_pad = ((B + sub - 1) // sub) * sub
    pad_b = B_pad - B

    x2d = jnp.pad(embed_x, ((0, 0), (0, pad_b), (0, 0))).reshape(T * B_pad, D).astype(in_dtype)
    len2d = jnp.pad(len_x.astype(jnp.int32), (0, pad_b)).reshape(B_pad, 1)
    max_len = jnp.minimum(jnp.max(len_x), T).astype(jnp.int32).reshape(1)

    # per-gate split of the input projection; fold the r/z recurrent biases into it
    w_ih, b_ih, b_hh = params["w_ih"], params["b_ih"], params["b_hh"]
    wih_r = w_ih[:, 0:H].astype(in_dtype)
    wih_z = w_ih[:, H:2 * H].astype(in_dtype)
    wih_n = w_ih[:, 2 * H:3 * H].astype(in_dtype)
    br = b_ih[:, 0:H] + b_hh[:, 0:H]
    bz = b_ih[:, H:2 * H] + b_hh[:, H:2 * H]
    bn = b_ih[:, 2 * H:3 * H]
    bhh_n = b_hh[:, 2 * H:3 * H]
    w_hh = params["w_hh"].astype(in_dtype)

    # fold the two classifier Linears (no activation between them in the module)
    wcls = params["w1"] @ params["w2"]                        # (H, C)
    bcls = params["b1"] @ params["w2"] + params["b2"]         # (1, C)

    itemsize = 2 if use_bf16 else 4
    vmem_bytes = (T * B_pad * D * itemsize                    # x2d
                  + 3 * T * B_pad * H * itemsize              # gi scratch
                  + (3 * D * H + 3 * H * H) * itemsize        # W_ih, W_hh
                  + (4 * H + H * C + C + B_pad * (C + 1)) * 4)
    vmem_limit = int(min(100 * 1024 * 1024,
                         max(4 * vmem_bytes + (4 << 20), 16 << 20)))

    smem = pl.BlockSpec(memory_space=pltpu.MemorySpace.SMEM)
    vmem = pl.BlockSpec(memory_space=pltpu.MemorySpace.VMEM)
    kernel = functools.partial(fused_gru_classifier_kernel, fuse_hh=(H % 128 == 0))

    out = pl.pallas_call(
        kernel,
        out_shape=jax.ShapeDtypeStruct((B_pad, C), jnp.float32),
        in_specs=[smem] + [vmem] * 12,
        out_specs=vmem,
        scratch_shapes=[pltpu.VMEM((T * B_pad, H), in_dtype)] * 3,
        compiler_params=pltpu.CompilerParams(vmem_limit_bytes=vmem_limit),
    )(max_len, x2d, len2d,
      wih_r, wih_z, wih_n, br, bz, bn,
      w_hh, bhh_n, wcls, bcls)

    return out[:B]                                            # (B, num_classifications)


# ----------------------------- pure-JAX reference ------------------------------
def reference_forward(x, len_x, params):
    emb = jnp.take(params["embedding"], x, axis=0)
    aff = jnp.take(params["affect_embedding"], x, axis=0)
    embed_x = jnp.transpose(jnp.concatenate([emb, aff], axis=2), (1, 0, 2))
    T, B, _ = embed_x.shape
    H = params["w_hh"].shape[0]

    def step(h, inp):
        xt, mt = inp
        gi = xt @ params["w_ih"] + params["b_ih"][0]
        gh = h @ params["w_hh"] + params["b_hh"][0]
        r = jax.nn.sigmoid(gi[:, :H] + gh[:, :H])
        z = jax.nn.sigmoid(gi[:, H:2 * H] + gh[:, H:2 * H])
        n = jnp.tanh(gi[:, 2 * H:] + r * gh[:, 2 * H:])
        h_new = (1 - z) * n + z * h
        h = mt * h_new + (1 - mt) * h
        return h, None

    t_idx = jnp.arange(T)[:, None]
    mask = (t_idx < len_x[None, :]).astype(jnp.float32)[..., None]
    h0 = jnp.zeros((B, H), jnp.float32)
    h_final, _ = jax.lax.scan(step, h0, (embed_x, mask))
    hid = h_final @ params["w1"] + params["b1"][0]
    logits = hid @ params["w2"] + params["b2"][0]
    return jax.nn.softmax(logits, axis=-1)


if __name__ == "__main__":
    # small synthetic config
    num_vocab = 32
    embedding_size = 24
    affect_embedding_size = 8
    encoder_output_size = 32          # GRU hidden size (1 layer, unidirectional)
    num_classifications = 4
    pad_id = 0
    B, T = 2, 8
    D_in = embedding_size + affect_embedding_size
    H = encoder_output_size

    key = jax.random.PRNGKey(0)
    ks = jax.random.split(key, 10)

    embedding = 0.1 * jax.random.normal(ks[0], (num_vocab, embedding_size), jnp.float32)
    embedding = embedding.at[pad_id].set(0.0)                 # padding_idx row is zero
    affect_embedding = 0.1 * jax.random.normal(ks[1], (num_vocab, affect_embedding_size), jnp.float32)
    affect_embedding = affect_embedding.at[pad_id].set(0.0)

    params = {
        "embedding": embedding,
        "affect_embedding": affect_embedding,
        # GRU params, gate order (r, z, n) as in PyTorch; stored input-major (D, 3H)
        "w_ih": 0.1 * jax.random.normal(ks[2], (D_in, 3 * H), jnp.float32),
        "w_hh": 0.1 * jax.random.normal(ks[3], (H, 3 * H), jnp.float32),
        "b_ih": 0.1 * jax.random.normal(ks[4], (1, 3 * H), jnp.float32),
        "b_hh": 0.1 * jax.random.normal(ks[5], (1, 3 * H), jnp.float32),
        # classifier: Linear(H -> H//2), Linear(H//2 -> C), Softmax(-1)
        "w1": 0.1 * jax.random.normal(ks[6], (H, H // 2), jnp.float32),
        "b1": 0.1 * jax.random.normal(ks[7], (1, H // 2), jnp.float32),
        "w2": 0.1 * jax.random.normal(ks[8], (H // 2, num_classifications), jnp.float32),
        "b2": 0.1 * jax.random.normal(ks[9], (1, num_classifications), jnp.float32),
    }

    x = jax.random.randint(jax.random.PRNGKey(42), (B, T), 1, num_vocab, jnp.int32)
    len_x = jnp.array([7, 5], dtype=jnp.int32)                # both < T: exercises max_len bound
    pos = jnp.arange(T, dtype=jnp.int32)[None, :]
    x = jnp.where(pos < len_x[:, None], x, pad_id)            # pad beyond len_x with pad_id

    ref = reference_forward(x, len_x, params)

    # f32 path (default): tight tolerance
    out = jax.block_until_ready(model_forward(x, len_x, params, use_bf16=False))
    assert out.shape == (B, num_classifications)
    assert jnp.allclose(out, ref, atol=1e-5, rtol=1e-5), (out, ref)
    assert jnp.allclose(jnp.sum(out, axis=-1), 1.0, atol=1e-5)

    # bf16 inputs/weights/scratch path (v6e/v7x recommendation): looser tolerance
    out_bf16 = jax.block_until_ready(model_forward(x, len_x, params, use_bf16=True))
    assert out_bf16.shape == (B, num_classifications)
    assert jnp.allclose(out_bf16, ref, atol=2e-2, rtol=2e-2), (out_bf16, ref)

    print("KERNEL_OK")
</pallas_src>

<mosaic_0001>
module attributes {stable_mosaic.version = 11 : i64} {
  func.func @fused_gru_classifier_kernel(%arg0: memref<1xi32, #tpu.memory_space<smem>>, %arg1: memref<64x32xf32, #tpu.memory_space<vmem>>, %arg2: memref<8x1xi32, #tpu.memory_space<vmem>>, %arg3: memref<32x32xf32, #tpu.memory_space<vmem>>, %arg4: memref<32x32xf32, #tpu.memory_space<vmem>>, %arg5: memref<32x32xf32, #tpu.memory_space<vmem>>, %arg6: memref<1x32xf32, #tpu.memory_space<vmem>>, %arg7: memref<1x32xf32, #tpu.memory_space<vmem>>, %arg8: memref<1x32xf32, #tpu.memory_space<vmem>>, %arg9: memref<32x96xf32, #tpu.memory_space<vmem>>, %arg10: memref<1x32xf32, #tpu.memory_space<vmem>>, %arg11: memref<32x4xf32, #tpu.memory_space<vmem>>, %arg12: memref<1x4xf32, #tpu.memory_space<vmem>>, %arg13: memref<8x4xf32, #tpu.memory_space<vmem>>, %arg14: memref<64x32xf32, #tpu.memory_space<vmem>>, %arg15: memref<64x32xf32, #tpu.memory_space<vmem>>, %arg16: memref<64x32xf32, #tpu.memory_space<vmem>>) attributes {dimension_semantics = [], scalar_prefetch = 0 : i64, scratch_operands = 3 : i64, tpu.core_type = #tpu.core_type<tc>} {
    %c0 = arith.constant 0 : index
    %c0_0 = arith.constant 0 : index
    %0 = vector.load %arg1[%c0, %c0_0] : memref<64x32xf32, #tpu.memory_space<vmem>>, vector<64x32xf32>
    %c0_1 = arith.constant 0 : index
    %c0_2 = arith.constant 0 : index
    %1 = vector.load %arg3[%c0_1, %c0_2] : memref<32x32xf32, #tpu.memory_space<vmem>>, vector<32x32xf32>
    %cst = arith.constant dense<0.000000e+00> : vector<64x32xf32>
    %2 = tpu.matmul %0, %1, %cst {dimension_numbers = #tpu.dot_dimension_numbers<[1], [0], [0], [1], [0, 0, 1, 1], [], []>} : vector<64x32xf32>, vector<32x32xf32>, vector<64x32xf32> -> vector<64x32xf32>
    %c0_3 = arith.constant 0 : index
    %c0_4 = arith.constant 0 : index
    %3 = vector.load %arg6[%c0_3, %c0_4] : memref<1x32xf32, #tpu.memory_space<vmem>>, vector<1x32xf32>
    %4 = vector.broadcast %3 : vector<1x32xf32> to vector<64x32xf32>
    %5 = arith.addf %2, %4 : vector<64x32xf32>
    %c0_5 = arith.constant 0 : index
    %c0_6 = arith.constant 0 : index
    %6 = vector.load %arg14[%c0_5, %c0_6] : memref<64x32xf32, #tpu.memory_space<vmem>>, vector<64x32xf32>
    tpu.vector_store %arg14[%c0_5, %c0_6], %5 {strides = array<i32>} : memref<64x32xf32, #tpu.memory_space<vmem>>, vector<64x32xf32>,
    %c0_7 = arith.constant 0 : index
    %c0_8 = arith.constant 0 : index
    %7 = vector.load %arg4[%c0_7, %c0_8] : memref<32x32xf32, #tpu.memory_space<vmem>>, vector<32x32xf32>
    %cst_9 = arith.constant dense<0.000000e+00> : vector<64x32xf32>
    %8 = tpu.matmul %0, %7, %cst_9 {dimension_numbers = #tpu.dot_dimension_numbers<[1], [0], [0], [1], [0, 0, 1, 1], [], []>} : vector<64x32xf32>, vector<32x32xf32>, vector<64x32xf32> -> vector<64x32xf32>
    %c0_10 = arith.constant 0 : index
    %c0_11 = arith.constant 0 : index
    %9 = vector.load %arg7[%c0_10, %c0_11] : memref<1x32xf32, #tpu.memory_space<vmem>>, vector<1x32xf32>
    %10 = vector.broadcast %9 : vector<1x32xf32> to vector<64x32xf32>
    %11 = arith.addf %8, %10 : vector<64x32xf32>
    %c0_12 = arith.constant 0 : index
    %c0_13 = arith.constant 0 : index
    %12 = vector.load %arg15[%c0_12, %c0_13] : memref<64x32xf32, #tpu.memory_space<vmem>>, vector<64x32xf32>
    tpu.vector_store %arg15[%c0_12, %c0_13], %11 {strides = array<i32>} : memref<64x32xf32, #tpu.memory_space<vmem>>, vector<64x32xf32>,
    %c0_14 = arith.constant 0 : index
    %c0_15 = arith.constant 0 : index
    %13 = vector.load %arg5[%c0_14, %c0_15] : memref<32x32xf32, #tpu.memory_space<vmem>>, vector<32x32xf32>
    %cst_16 = arith.constant dense<0.000000e+00> : vector<64x32xf32>
    %14 = tpu.matmul %0, %13, %cst_16 {dimension_numbers = #tpu.dot_dimension_numbers<[1], [0], [0], [1], [0, 0, 1, 1], [], []>} : vector<64x32xf32>, vector<32x32xf32>, vector<64x32xf32> -> vector<64x32xf32>
    %c0_17 = arith.constant 0 : index
    %c0_18 = arith.constant 0 : index
    %15 = vector.load %arg8[%c0_17, %c0_18] : memref<1x32xf32, #tpu.memory_space<vmem>>, vector<1x32xf32>
    %16 = vector.broadcast %15 : vector<1x32xf32> to vector<64x32xf32>
    %17 = arith.addf %14, %16 : vector<64x32xf32>
    %c0_19 = arith.constant 0 : index
    %c0_20 = arith.constant 0 : index
    %18 = vector.load %arg16[%c0_19, %c0_20] : memref<64x32xf32, #tpu.memory_space<vmem>>, vector<64x32xf32>
    tpu.vector_store %arg16[%c0_19, %c0_20], %17 {strides = array<i32>} : memref<64x32xf32, #tpu.memory_space<vmem>>, vector<64x32xf32>,
    %c0_21 = arith.constant 0 : index
    %c0_22 = arith.constant 0 : index
    %19 = vector.load %arg10[%c0_21, %c0_22] : memref<1x32xf32, #tpu.memory_space<vmem>>, vector<1x32xf32>
    %c0_23 = arith.constant 0 : index
    %c0_24 = arith.constant 0 : index
    %20 = vector.load %arg2[%c0_23, %c0_24] : memref<8x1xi32, #tpu.memory_space<vmem>>, vector<8x1xi32>
    %c0_25 = arith.constant 0 : index
    %c0_26 = arith.constant 0 : index
    %21 = vector.load %arg9[%c0_25, %c0_26] : memref<32x96xf32, #tpu.memory_space<vmem>>, vector<32x96xf32>
    %22 = vector.extract_strided_slice %21 {offsets = [0, 0], sizes = [32, 32], strides = [1, 1]} : vector<32x96xf32> to vector<32x32xf32>
    %23 = vector.extract_strided_slice %21 {offsets = [0, 32], sizes = [32, 32], strides = [1, 1]} : vector<32x96xf32> to vector<32x32xf32>
    %24 = vector.extract_strided_slice %21 {offsets = [0, 64], sizes = [32, 32], strides = [1, 1]} : vector<32x96xf32> to vector<32x32xf32>
    %cst_27 = arith.constant 0.000000e+00 : f32
    %25 = vector.broadcast %cst_27 : f32 to vector<8x32xf32>
    %c0_28 = arith.constant 0 : index
    %26 = memref.load %arg0[%c0_28] : memref<1xi32, #tpu.memory_space<smem>>
    %c0_i32 = arith.constant 0 : i32
    %27 = arith.subi %26, %c0_i32 : i32
    %28 = arith.addi %c0_i32, %27 : i32
    %c1_i32 = arith.constant 1 : i32
    %29 = scf.for %arg17 = %c0_i32 to %28 step %c1_i32 iter_args(%arg18 = %25) -> (vector<8x32xf32>)  : i32 {
      %c8_i32 = arith.constant 8 : i32
      %45 = arith.muli %arg17, %c8_i32 : i32
      %46 = tpu.assume_multiple %45, 8 : i32
      %47 = arith.index_cast %46 : i32 to index
      %c0_38 = arith.constant 0 : index
      %48 = vector.load %arg14[%47, %c0_38] : memref<64x32xf32, #tpu.memory_space<vmem>>, vector<8x32xf32>
      %49 = arith.index_cast %46 : i32 to index
      %c0_39 = arith.constant 0 : index
      %50 = vector.load %arg15[%49, %c0_39] : memref<64x32xf32, #tpu.memory_space<vmem>>, vector<8x32xf32>
      %51 = arith.index_cast %46 : i32 to index
      %c0_40 = arith.constant 0 : index
      %52 = vector.load %arg16[%51, %c0_40] : memref<64x32xf32, #tpu.memory_space<vmem>>, vector<8x32xf32>
      %cst_41 = arith.constant dense<0.000000e+00> : vector<8x32xf32>
      %53 = tpu.matmul %arg18, %22, %cst_41 {dimension_numbers = #tpu.dot_dimension_numbers<[1], [0], [0], [1], [0, 0, 1, 1], [], []>} : vector<8x32xf32>, vector<32x32xf32>, vector<8x32xf32> -> vector<8x32xf32>
      %cst_42 = arith.constant dense<0.000000e+00> : vector<8x32xf32>
      %54 = tpu.matmul %arg18, %23, %cst_42 {dimension_numbers = #tpu.dot_dimension_numbers<[1], [0], [0], [1], [0, 0, 1, 1], [], []>} : vector<8x32xf32>, vector<32x32xf32>, vector<8x32xf32> -> vector<8x32xf32>
      %cst_43 = arith.constant dense<0.000000e+00> : vector<8x32xf32>
      %55 = tpu.matmul %arg18, %24, %cst_43 {dimension_numbers = #tpu.dot_dimension_numbers<[1], [0], [0], [1], [0, 0, 1, 1], [], []>} : vector<8x32xf32>, vector<32x32xf32>, vector<8x32xf32> -> vector<8x32xf32>
      %56 = arith.addf %48, %53 : vector<8x32xf32>
      %57 = arith.negf %56 : vector<8x32xf32>
      %58 = math.exp %57 : vector<8x32xf32>
      %cst_44 = arith.constant 1.000000e+00 : f32
      %59 = vector.broadcast %cst_44 : f32 to vector<8x32xf32>
      %60 = arith.addf %59, %58 : vector<8x32xf32>
      %61 = arith.divf %59, %60 : vector<8x32xf32>
      %62 = arith.addf %50, %54 : vector<8x32xf32>
      %63 = arith.negf %62 : vector<8x32xf32>
      %64 = math.exp %63 : vector<8x32xf32>
      %cst_45 = arith.constant 1.000000e+00 : f32
      %65 = vector.broadcast %cst_45 : f32 to vector<8x32xf32>
      %66 = arith.addf %65, %64 : vector<8x32xf32>
      %67 = arith.divf %65, %66 : vector<8x32xf32>
      %68 = vector.broadcast %19 : vector<1x32xf32> to vector<8x32xf32>
      %69 = arith.addf %55, %68 : vector<8x32xf32>
      %70 = arith.mulf %61, %69 : vector<8x32xf32>
      %71 = arith.addf %52, %70 : vector<8x32xf32>
      %72 = math.tanh %71 : vector<8x32xf32>
      %cst_46 = arith.constant 1.000000e+00 : f32
      %73 = vector.broadcast %cst_46 : f32 to vector<8x32xf32>
      %74 = arith.subf %73, %67 : vector<8x32xf32>
      %75 = arith.mulf %74, %72 : vector<8x32xf32>
      %76 = arith.mulf %67, %arg18 : vector<8x32xf32>
      %77 = arith.addf %75, %76 : vector<8x32xf32>
      %78 = vector.broadcast %arg17 : i32 to vector<8x1xi32>
      %79 = arith.cmpi slt, %78, %20 : vector<8x1xi32>
      %80 = vector.shape_cast %79 : vector<8x1xi1> to vector<8x1xi1>
      %81 = vector.broadcast %80 : vector<8x1xi1> to vector<8x32xi1>
      %82 = arith.select %81, %77, %arg18 : vector<8x32xi1>, vector<8x32xf32>
      scf.yield %82 : vector<8x32xf32>
    }
    %c0_29 = arith.constant 0 : index
    %c0_30 = arith.constant 0 : index
    %30 = vector.load %arg11[%c0_29, %c0_30] : memref<32x4xf32, #tpu.memory_space<vmem>>, vector<32x4xf32>
    %cst_31 = arith.constant dense<0.000000e+00> : vector<8x4xf32>
    %31 = tpu.matmul %29, %30, %cst_31 {dimension_numbers = #tpu.dot_dimension_numbers<[1], [0], [0], [1], [0, 0, 1, 1], [], []>} : vector<8x32xf32>, vector<32x4xf32>, vector<8x4xf32> -> vector<8x4xf32>
    %c0_32 = arith.constant 0 : index
    %c0_33 = arith.constant 0 : index
    %32 = vector.load %arg12[%c0_32, %c0_33] : memref<1x4xf32, #tpu.memory_space<vmem>>, vector<1x4xf32>
    %33 = vector.broadcast %32 : vector<1x4xf32> to vector<8x4xf32>
    %34 = arith.addf %31, %33 : vector<8x4xf32>
    %cst_34 = arith.constant dense<0xFF800000> : vector<8xf32>
    %35 = vector.multi_reduction <maximumf>, %34, %cst_34 [1] : vector<8x4xf32> to vector<8xf32>
    %36 = vector.shape_cast %35 : vector<8xf32> to vector<8x1xf32>
    %37 = vector.broadcast %36 : vector<8x1xf32> to vector<8x4xf32>
    %38 = arith.subf %34, %37 : vector<8x4xf32>
    %39 = math.exp %38 : vector<8x4xf32>
    %cst_35 = arith.constant dense<0.000000e+00> : vector<8xf32>
    %40 = vector.multi_reduction <add>, %39, %cst_35 [1] : vector<8x4xf32> to vector<8xf32>
    %41 = vector.shape_cast %40 : vector<8xf32> to vector<8x1xf32>
    %42 = vector.broadcast %41 : vector<8x1xf32> to vector<8x4xf32>
    %43 = arith.divf %39, %42 : vector<8x4xf32>
    %c0_36 = arith.constant 0 : index
    %c0_37 = arith.constant 0 : index
    %44 = vector.load %arg13[%c0_36, %c0_37] : memref<8x4xf32, #tpu.memory_space<vmem>>, vector<8x4xf32>
    tpu.vector_store %arg13[%c0_36, %c0_37], %43 {strides = array<i32>} : memref<8x4xf32, #tpu.memory_space<vmem>>, vector<8x4xf32>,
    return
  }
}

</mosaic_0001>

<bundles_post_ra>
// kernel: model_forward.1
= control target key start
LH: loop header
LB: loop body
LE: loop exit
PB: predicated region body
PF: predicated region fallthrough
CT: control target
= control target key end

     0   :  { %vm64_vm0 = vcmask 261120   ;;  %s1436_s0 = inlined_call_operand.<no memory space> [shape: s32[1], index: 0, kind: input, shape index: {}]   ;;  %s1437_s3 = inlined_call_operand.vmem [shape: f32[32,32], index: 3, kind: input, shape index: {}]   ;;  %s1438_s11 = inlined_call_operand.vmem [shape: f32[32,4], index: 11, kind: input, shape index: {}]   ;;  %s1439_s12 = inlined_call_operand.vmem [shape: f32[1,4], index: 12, kind: input, shape index: {}]   ;;  %s1440_s13 = inlined_call_operand.vmem [shape: f32[8,4], index: 13, kind: output, shape index: {}]   ;;  %s1441_s1 = inlined_call_operand.vmem [shape: f32[64,32], index: 1, kind: input, shape index: {}]   ;;  %s1442_s4 = inlined_call_operand.vmem [shape: f32[32,32], index: 4, kind: input, shape index: {}]   ;;  %s1443_s5 = inlined_call_operand.vmem [shape: f32[32,32], index: 5, kind: input, shape index: {}]   ;;  %s1444_s2 = inlined_call_operand.vmem [shape: s32[8,1], index: 2, kind: input, shape index: {}]   ;;  %s1445_s9 = inlined_call_operand.vmem [shape: f32[32,96], index: 9, kind: input, shape index: {}]   ;;  %s1446_s10 = inlined_call_operand.vmem [shape: f32[1,32], index: 10, kind: input, shape index: {}]   ;;  %s1447_s6 = inlined_call_operand.vmem [shape: f32[1,32], index: 6, kind: input, shape index: {}]   ;;  %s1448_s7 = inlined_call_operand.vmem [shape: f32[1,32], index: 7, kind: input, shape index: {}]   ;;  %s1449_s8 = inlined_call_operand.vmem [shape: f32[1,32], index: 8, kind: input, shape index: {}]  }
   0x1   :  { %v56_v0 = vld [vmem:[%s1437_s3 + $0x18] sm:$0xff]  ;;  %v55_v1 = vld [vmem:[%s1437_s3 + $0x10] sm:$0xff]  ;;  %v54_v2 = vld [vmem:[%s1437_s3 + $0x8] sm:$0xff]  ;;  %p889_p0 = scmp.le.s32.totalorder %s1436_s0, 0 }
   0x2   :  { %955 = vmatprep.subr.mxu0 %v56_v0  ;;  %1059 = vmatprep.subr.mxu1 %v56_v0  ;;  %v53_v3 = vld [vmem:[%s1437_s3] sm:$0xff]  ;;  %v46_v6 = vld [vmem:[%s1441_s1 + $0x8] sm:$0xff]  ;;  %v205_v8 = vld [vmem:[%s1442_s4 + $0x18] sm:$0xff]  ;;  %s1368_s22 = smov (!%p889_p0), 0  }
   0x3   :  { %956 = vmatpush3.msra.mxu0 %v56_v0  ;;  %1063 = vmatpush3.msra.mxu1 %v56_v0  ;;  %v45_v4 = vld [vmem:[%s1441_s1] sm:$0xff]  ;;  %v50_v7 = vld [vmem:[%s1441_s1 + $0x28] sm:$0xff]  ;;  %v329_v9 = vld [vmem:[%s1443_s5 + $0x18] sm:$0xff] }
   0x4   :  { %957 = vmatprep.subr.mxu0 %v55_v1  ;;  %1060 = vmatprep.subr.mxu1 %v55_v1  ;;  %v49_v5 = vld [vmem:[%s1441_s1 + $0x20] sm:$0xff]  ;;  %v204_v10 = vld [vmem:[%s1442_s4 + $0x10] sm:$0xff]  ;;  %v48_v14 = vld [vmem:[%s1441_s1 + $0x18] sm:$0xff] }
   0x5   :  { %958 = vmatpush3.msra.mxu0 %v55_v1  ;;  %1064 = vmatpush3.msra.mxu1 %v55_v1  ;;  %v328_v11 = vld [vmem:[%s1443_s5 + $0x10] sm:$0xff]  ;;  %v52_v15 = vld [vmem:[%s1441_s1 + $0x38] sm:$0xff]  ;;  %v203_v16 = vld [vmem:[%s1442_s4 + $0x8] sm:$0xff] }
   0x6   :  { %959 = vmatprep.subr.mxu0 %v54_v2  ;;  %1061 = vmatprep.subr.mxu1 %v54_v2  ;;  %v47_v12 = vld [vmem:[%s1441_s1 + $0x10] sm:$0xff]  ;;  %v327_v17 = vld [vmem:[%s1443_s5 + $0x8] sm:$0xff]  ;;  %v202_v18 = vld [vmem:[%s1442_s4] sm:$0xff] }
   0x7   :  { %960 = vmatpush3.msra.mxu0 %v54_v2  ;;  %1065 = vmatpush3.msra.mxu1 %v54_v2  ;;  %v51_v13 = vld [vmem:[%s1441_s1 + $0x30] sm:$0xff]  ;;  %v326_v19 = vld [vmem:[%s1443_s5] sm:$0xff]  ;;  %v1316_v23 = vld [vmem:[%s1445_s9 + $0x8] sm:$0xff] }
   0x8   :  { %961 = vmatprep.subr.mxu0 %v53_v3  ;;  %1062 = vmatprep.subr.mxu1 %v53_v3  ;;  %v1301_v20 = vld [vmem:[%s1446_s10] ss:$0 sm:$0xff]  ;;  %v1321_v24 = vld [vmem:[%s1445_s9 + $0x10] sm:$0xff]  ;;  %v1326_v25 = vld [vmem:[%s1445_s9 + $0x18] sm:$0xff] }
   0x9   :  { %962 = vmatpush3.msra.mxu0 %v53_v3  ;;  %1066 = vmatpush3.msra.mxu1 %v53_v3  ;;  %v1306_v21 = vld [vmem:[%s1444_s2] sm:$0xff] }
   0xa   :  { %963 = vmatprep.mubr.msk.f32.mxu0 %vm64_vm0, %v45_v4  ;;  %969 = vmatprep.mubr.msk.f32.mxu1 %vm64_vm0, %v49_v5  ;;  %v1311_v22 = vld [vmem:[%s1445_s9] sm:$0xff] }
   0xb   :  { %964 = vmatmul.mubr.msk.f32.vlgmr.msra.gmra.mxu0 %vm64_vm0, %v46_v6  ;;  %970 = vmatmul.mubr.msk.f32.vlgmr.msra.gmra.mxu1 %vm64_vm0, %v50_v7  ;;  %v862_v26 = vld [vmem:[%s1447_s6] ss:$0 sm:$0xff] }
   0xc   :  { %975 = vmatprep.subr.mxu1 %v205_v8  ;;  %995 = vmatprep.subr.mxu0 %v329_v9  ;;  %v871_v43 = vld [vmem:[%s1448_s7] ss:$0 sm:$0xff] }
   0xd   :  { %976 = vmatpush3.msra.mxu1 %v205_v8  ;;  %996 = vmatpush3.msra.mxu0 %v329_v9  ;;  %v880_v44 = vld [vmem:[%s1449_s8] ss:$0 sm:$0xff] }
   0xe   :  { %977 = vmatprep.subr.mxu1 %v204_v10  ;;  %997 = vmatprep.subr.mxu0 %v328_v11 }
   0xf   :  { %966 = vmatprep.mubr.msk.f32.mxu0 %vm64_vm0, %v47_v12  ;;  %972 = vmatprep.mubr.msk.f32.mxu1 %vm64_vm0, %v51_v13 }
  0x10   :  { %978 = vmatpush3.msra.mxu1 %v204_v10  ;;  %998 = vmatpush3.msra.mxu0 %v328_v11 }
  0x11   :  { %967 = vmatmul.mubr.msk.f32.gmra.mxu0 %vm64_vm0, %v48_v14  ;;  %973 = vmatmul.mubr.msk.f32.gmra.mxu1 %vm64_vm0, %v52_v15 }
  0x12   :  { %979 = vmatprep.subr.mxu1 %v203_v16  ;;  %999 = vmatprep.subr.mxu0 %v327_v17 }
  0x13   :  { %980 = vmatpush3.msra.mxu1 %v203_v16  ;;  %1000 = vmatpush3.msra.mxu0 %v327_v17 }
  0x14   :  { %981 = vmatprep.subr.mxu1 %v202_v18  ;;  %1001 = vmatprep.subr.mxu0 %v326_v19 }
  0x15   :  { %982 = vmatpush3.msra.mxu1 %v202_v18  ;;  %983 = vmatprep.mubr.msk.f32.mxu1 %vm64_vm0, %v45_v4 }
  0x16   :  { %1002 = vmatpush3.msra.mxu0 %v326_v19  ;;  %1003 = vmatprep.mubr.msk.f32.mxu0 %vm64_vm0, %v45_v4 }
  0x17   :  { %984 = vmatmul.mubr.msk.f32.vlgmr.msra.gmra.mxu1 %vm64_vm0, %v46_v6  ;;  %1004 = vmatmul.mubr.msk.f32.vlgmr.msra.gmra.mxu0 %vm64_vm0, %v46_v6 }
  0x18   :  { %986 = vmatprep.mubr.msk.f32.mxu1 %vm64_vm0, %v47_v12  ;;  %1006 = vmatprep.mubr.msk.f32.mxu0 %vm64_vm0, %v47_v12 }
  0x1b   :  { %987 = vmatmul.mubr.msk.f32.gmra.mxu1 %vm64_vm0, %v48_v14  ;;  %1007 = vmatmul.mubr.msk.f32.gmra.mxu0 %vm64_vm0, %v48_v14 }
  0x1c   :  { %989 = vmatprep.mubr.msk.f32.mxu1 %vm64_vm0, %v49_v5  ;;  %1009 = vmatprep.mubr.msk.f32.mxu0 %vm64_vm0, %v49_v5 }
  0x1f   :  { %990 = vmatmul.mubr.msk.f32.gmra.mxu1 %vm64_vm0, %v50_v7  ;;  %1010 = vmatmul.mubr.msk.f32.gmra.mxu0 %vm64_vm0, %v50_v7 }
  0x20   :  { %992 = vmatprep.mubr.msk.f32.mxu1 %vm64_vm0, %v51_v13  ;;  %1012 = vmatprep.mubr.msk.f32.mxu0 %vm64_vm0, %v51_v13  ;;  %v1364_v13 = vmov 0.0  }
  0x23   :  { %993 = vmatmul.mubr.msk.f32.gmra.mxu1 %vm64_vm0, %v52_v15  ;;  %1013 = vmatmul.mubr.msk.f32.gmra.mxu0 %vm64_vm0, %v52_v15 }
  0xcb   :  { %v965_v27 = vpop.f32.mrf.mxu0  ;;  %v971_v28 = vpop.f32.mrf.mxu1 }
  0xcc   :  { %v161_v29 = vadd.f32 %v965_v27, %v862_v26  ;;  %v181_v30 = vadd.f32 %v971_v28, %v862_v26 }
  0xcd   :  { %v155_v31 = vpop.f32.mrf.mxu0  ;;  %v175_v32 = vpop.f32.mrf.mxu1 }
  0xce   :  { %195 = vst.msk [vmem:[#allocation2 + $0x8] sm:$0xff] %vm64_vm0, %v161_v29  ;;  %199 = vst.msk [vmem:[#allocation2 + $0x28] sm:$0xff] %vm64_vm0, %v181_v30  ;;  %v156_v33 = vadd.f32 %v862_v26, %v155_v31  ;;  %v176_v34 = vadd.f32 %v862_v26, %v175_v32 }
  0xd0   :  { %194 = vst.msk [vmem:[#allocation2] sm:$0xff] %vm64_vm0, %v156_v33  ;;  %198 = vst.msk [vmem:[#allocation2 + $0x20] sm:$0xff] %vm64_vm0, %v176_v34 }
  0xd1   :  { %v968_v35 = vpop.f32.mrf.mxu0  ;;  %v974_v36 = vpop.f32.mrf.mxu1 }
  0xd2   :  { %v171_v37 = vadd.f32 %v968_v35, %v862_v26  ;;  %v191_v38 = vadd.f32 %v974_v36, %v862_v26 }
  0xd3   :  { %v165_v39 = vpop.f32.mrf.mxu0  ;;  %v185_v40 = vpop.f32.mrf.mxu1 }
  0xd4   :  { %197 = vst.msk [vmem:[#allocation2 + $0x18] sm:$0xff] %vm64_vm0, %v171_v37  ;;  %201 = vst.msk [vmem:[#allocation2 + $0x38] sm:$0xff] %vm64_vm0, %v191_v38  ;;  %v166_v41 = vadd.f32 %v862_v26, %v165_v39  ;;  %v186_v42 = vadd.f32 %v862_v26, %v185_v40 }
  0xd6   :  { %196 = vst.msk [vmem:[#allocation2 + $0x10] sm:$0xff] %vm64_vm0, %v166_v41  ;;  %200 = vst.msk [vmem:[#allocation2 + $0x30] sm:$0xff] %vm64_vm0, %v186_v42 }
  0xd7   :  { %v985_v45 = vpop.f32.mrf.mxu1  ;;  %v1005_v46 = vpop.f32.mrf.mxu0 }
  0xd8   :  { %v285_v47 = vadd.f32 %v985_v45, %v871_v43  ;;  %v409_v48 = vadd.f32 %v1005_v46, %v880_v44 }
  0xd9   :  { %v279_v49 = vpop.f32.mrf.mxu1  ;;  %v403_v50 = vpop.f32.mrf.mxu0 }
  0xda   :  { %319 = vst.msk [vmem:[#allocation3 + $0x8] sm:$0xff] %vm64_vm0, %v285_v47  ;;  %443 = vst.msk [vmem:[#allocation4 + $0x8] sm:$0xff] %vm64_vm0, %v409_v48  ;;  %v280_v51 = vadd.f32 %v871_v43, %v279_v49  ;;  %v404_v52 = vadd.f32 %v880_v44, %v403_v50 }
  0xdb   :  { %v988_v53 = vpop.f32.mrf.mxu1  ;;  %v1008_v54 = vpop.f32.mrf.mxu0 }
  0xdc   :  { %318 = vst.msk [vmem:[#allocation3] sm:$0xff] %vm64_vm0, %v280_v51  ;;  %442 = vst.msk [vmem:[#allocation4] sm:$0xff] %vm64_vm0, %v404_v52  ;;  %v295_v55 = vadd.f32 %v988_v53, %v871_v43  ;;  %v419_v56 = vadd.f32 %v1008_v54, %v880_v44 }
  0xdd   :  { %v289_v57 = vpop.f32.mrf.mxu1  ;;  %v413_v58 = vpop.f32.mrf.mxu0 }
  0xde   :  { %321 = vst.msk [vmem:[#allocation3 + $0x18] sm:$0xff] %vm64_vm0, %v295_v55  ;;  %445 = vst.msk [vmem:[#allocation4 + $0x18] sm:$0xff] %vm64_vm0, %v419_v56  ;;  %v290_v59 = vadd.f32 %v871_v43, %v289_v57  ;;  %v414_v60 = vadd.f32 %v880_v44, %v413_v58 }
  0xdf   :  { %v991_v61 = vpop.f32.mrf.mxu1  ;;  %v1011_v62 = vpop.f32.mrf.mxu0 }
  0xe0   :  { %320 = vst.msk [vmem:[#allocation3 + $0x10] sm:$0xff] %vm64_vm0, %v290_v59  ;;  %444 = vst.msk [vmem:[#allocation4 + $0x10] sm:$0xff] %vm64_vm0, %v414_v60  ;;  %v305_v63 = vadd.f32 %v991_v61, %v871_v43  ;;  %v429_v0 = vadd.f32 %v1011_v62, %v880_v44 }
  0xe1   :  { %v299_v1 = vpop.f32.mrf.mxu1  ;;  %v423_v2 = vpop.f32.mrf.mxu0 }
  0xe2   :  { %323 = vst.msk [vmem:[#allocation3 + $0x28] sm:$0xff] %vm64_vm0, %v305_v63  ;;  %447 = vst.msk [vmem:[#allocation4 + $0x28] sm:$0xff] %vm64_vm0, %v429_v0  ;;  %v300_v3 = vadd.f32 %v871_v43, %v299_v1  ;;  %v424_v4 = vadd.f32 %v880_v44, %v423_v2 }
  0xe3   :  { %v994_v5 = vpop.f32.mrf.mxu1  ;;  %v1014_v6 = vpop.f32.mrf.mxu0 }
  0xe4   :  { %322 = vst.msk [vmem:[#allocation3 + $0x20] sm:$0xff] %vm64_vm0, %v300_v3  ;;  %446 = vst.msk [vmem:[#allocation4 + $0x20] sm:$0xff] %vm64_vm0, %v424_v4  ;;  %v315_v7 = vadd.f32 %v994_v5, %v871_v43  ;;  %v439_v8 = vadd.f32 %v1014_v6, %v880_v44  ;;  %857 = sbr.rel (%p889_p0) target bundleno = 594 (0x252), region = 76 }
  0xe5   :  { %v309_v9 = vpop.f32.mrf.mxu1  ;;  %v433_v10 = vpop.f32.mrf.mxu0 }
  0xe6   :  { %325 = vst.msk [vmem:[#allocation3 + $0x38] sm:$0xff] %vm64_vm0, %v315_v7  ;;  %449 = vst.msk [vmem:[#allocation4 + $0x38] sm:$0xff] %vm64_vm0, %v439_v8  ;;  %v310_v11 = vadd.f32 %v871_v43, %v309_v9  ;;  %v434_v12 = vadd.f32 %v880_v44, %v433_v10 }
  0xe8   :  { %324 = vst.msk [vmem:[#allocation3 + $0x30] sm:$0xff] %vm64_vm0, %v310_v11  ;;  %448 = vst.msk [vmem:[#allocation4 + $0x30] sm:$0xff] %vm64_vm0, %v434_v12 }
  0xe9   :  { %v1366_v14 = vmov 0.0  }
  0xea LB: > { %s1137_s23 = smov 96   ;;  %v1138_v15 = vmov 0.0   ;;  %vm1139_vm1 = vmmov 0   ;;  %v1140_v16 = vmov 0   ;;  %v739_v17 = vstv %s1131_s22  ;;  %s1141_s24 = smov 64   ;;  %s1131_s22 = sphi %s1368_s22, %s460_s22   ;;  %v1127_v14 = vphi %v1366_v14, %v1450_v14  }
  0xeb   : > { %554 = vrot.lane.b32.xlu0 %v1326_v25, %s1137_s23  ;;  %550 = vrot.lane.b32.xlu1 %v1316_v23, %s1137_s23  ;;  %vm740_vm2 = vcmp.lt.s32.totalorder %v739_v17, %v1306_v21  ;;  %s890_s25 = sshll.u32 %s1131_s22, 3  ;;  %s460_s22 = sadd.s32 1, %s1131_s22  }
  0xec   : > { %1015 = vmatprep.subr.mxu0 %v1138_v15  ;;  %1023 = vmatprep.mubr.msk.f32.mxu0 %vm1139_vm1, %v1138_v15  ;;  %v741_v18 = vsel %vm740_vm2, 1, %v1140_v16  ;;  %s465_s1 = scalar_lea.vmem [#allocation2], %s890_s25  ;;  %s467_s26 = scalar_lea.vmem [#allocation3], %s890_s25 }
  0xed   : > { %1016 = vmatpush3.msra.mxu0 %v1326_v25  ;;  %1026 = vmatprep.subr.mxu1 %v1138_v15  ;;  %v466_v33 = vld [vmem:[%s465_s1] sm:$0xff]  ;;  %s469_s27 = scalar_lea.vmem [#allocation4], %s890_s25  ;;  %p459_p1 = scmp.ge.s32.totalorder %s460_s22, %s1436_s0 }
  0xee   : > { %1017 = vmatprep.subr.mxu0 %v1138_v15  ;;  %1034 = vmatprep.mubr.msk.f32.mxu1 %vm1139_vm1, %v1138_v15 }
  0xef   : > { %552 = vrot.lane.b32.xlu0 %v1321_v24, %s1137_s23  ;;  %548 = vrot.lane.b32.xlu1 %v1311_v22, %s1137_s23  ;;  %v468_v40 = vld [vmem:[%s467_s26] sm:$0xff] }
  0xf0   : > { %1018 = vmatpush3.msra.mxu0 %v1321_v24  ;;  %1098 = vset.pattern.permute.xlu0 %v1140_v16  ;;  %v470_v48 = vld [vmem:[%s469_s27] sm:$0xff] }
  0xf1   : > { %1019 = vmatprep.subr.mxu0 %v1138_v15 }
  0xf2   : > { %1020 = vmatpush3.msra.mxu0 %v1316_v23 }
  0xf3   : > { %656 = vrot.lane.b32.xlu0 %v1326_v25, %s1141_s24  ;;  %654 = vrot.lane.b32.xlu1 %v1321_v24, %s1141_s24 }
  0xf4   : > { %1021 = vmatprep.subr.mxu0 %v1138_v15 }
  0xf5   : > { %1022 = vmatpush3.msra.mxu0 %v1311_v22 }
  0xf6   : > { %1024 = vmatmul.mubr.msk.f32.vlgmr.msra.gmra.mxu0 %vm64_vm0, %v1127_v14  ;;  %1037 = vmatprep.subr.mxu0 %v1138_v15 }
  0xf7   : > { %652 = vrot.lane.b32.xlu0 %v1316_v23, %s1141_s24  ;;  %650 = vrot.lane.b32.xlu1 %v1311_v22, %s1141_s24 }
  0xf8   : > { %1045 = vmatprep.mubr.msk.f32.mxu0 %vm1139_vm1, %v1138_v15 }
  0xfb   : > { %743 = vperm.xlu0 %1098, %v741_v18  }
 0x15d   : > { %v555_v19 = vpop.permute.xlu0 %554  ;;  %v551_v26 = vpop.permute.xlu1 %550 }
 0x15e   : > { %1027 = vmatpush3.msra.mxu1 %v555_v19 }
 0x15f   : > { %1028 = vmatprep.subr.mxu1 %v1138_v15 }
 0x161   : > { %v553_v27 = vpop.permute.xlu0 %552  ;;  %v549_v28 = vpop.permute.xlu1 %548 }
 0x162   : > { %1029 = vmatpush3.msra.mxu1 %v553_v27 }
 0x163   : > { %1030 = vmatprep.subr.mxu1 %v1138_v15 }
 0x164   : > { %1031 = vmatpush3.msra.mxu1 %v551_v26 }
 0x165   : > { %1032 = vmatprep.subr.mxu1 %v1138_v15  ;;  %v657_v29 = vpop.permute.xlu0 %656  ;;  %v655_v30 = vpop.permute.xlu1 %654 }
 0x166   : > { %1033 = vmatpush3.msra.mxu1 %v549_v28  ;;  %1038 = vmatpush3.msra.mxu0 %v657_v29 }
 0x167   : > { %1035 = vmatmul.mubr.msk.f32.vlgmr.msra.gmra.mxu1 %vm64_vm0, %v1127_v14  ;;  %1039 = vmatprep.subr.mxu0 %v1138_v15 }
 0x168   : > { %1040 = vmatpush3.msra.mxu0 %v655_v30 }
 0x169   : > { %v653_v31 = vpop.permute.xlu0 %652  ;;  %1041 = vmatprep.subr.mxu0 %v1138_v15  ;;  %v651_v32 = vpop.permute.xlu1 %650 }
 0x16a   : > { %1042 = vmatpush3.msra.mxu0 %v653_v31 }
 0x16b   : > { %1043 = vmatprep.subr.mxu0 %v1138_v15 }
 0x16c   : > { %1044 = vmatpush3.msra.mxu0 %v651_v32 }
 0x16d   : > { %1046 = vmatmul.mubr.msk.f32.vlgmr.msra.gmra.mxu0 %vm64_vm0, %v1127_v14 }
 0x176   : > { %v744_v56 = vpop.permute.xlu0 %743 }
 0x177   : > { %vm745_vm3 = vcmp.eq.s32.totalorder %v744_v56, 1 }
 0x1b6   : > { %v540_v34 = vpop.f32.mrf.mxu0 }
 0x1b7   : > { %v630_v35 = vadd.f32 %v540_v34, %v466_v33 }
 0x1b8   : > { %v1025_v36 = vpop.f32.mrf.mxu0 }
 0x1b9   : > { %v893_v37 = vmul.f32 -1.442695, %v630_v35 }
 0x1bb   : > { %1099 = vpow2.f32 %v893_v37 }
 0x1c8   : > { %v1100_v38 = vpop.eup %1099 }
 0x1c9   : > { %v634_v39 = vadd.f32 1.0, %v1100_v38 }
 0x1cb   : > { %1101 = vrcp.f32 %v634_v39 }
 0x1d8   : > { %v1102_v45 = vpop.eup %1101 }
 0x227   : > { %v626_v41 = vpop.f32.mrf.mxu1 }
 0x228   : > { %v637_v42 = vadd.f32 %v626_v41, %v468_v40 }
 0x229   : > { %v1036_v43 = vpop.f32.mrf.mxu1 }
 0x22a   : > { %v894_v44 = vmul.f32 -1.442695, %v637_v42 }
 0x22c   : > { %1103 = vpow2.f32 %v894_v44 }
 0x22d   : > { %v728_v46 = vpop.f32.mrf.mxu0 }
 0x22e   : > { %v729_v47 = vadd.f32 %v1301_v20, %v728_v46 }
 0x22f   : > { %v1047_v49 = vpop.f32.mrf.mxu0 }
 0x230   : > { %v732_v50 = vmul.f32 %v1102_v45, %v729_v47 }
 0x232   : > { %v733_v51 = vadd.f32 %v732_v50, %v470_v48 }
 0x234   : > { %1105 = vtanh.f32 %v733_v51 }
 0x239   : > { %v1104_v52 = vpop.eup %1103 }
 0x23a   : > { %v641_v53 = vadd.f32 1.0, %v1104_v52 }
 0x23c   : > { %1107 = vrcp.f32 %v641_v53 }
 0x241   : > { %v1106_v54 = vpop.eup %1105 }
 0x249   : > { %v1108_v55 = vpop.eup %1107 }
 0x24a   : > { %v735_v57 = vsub.f32 1.0, %v1108_v55  ;;  %v737_v59 = vmul.f32 %v1127_v14, %v1108_v55 }
 0x24c   : > { %v736_v58 = vmul.f32 %v1106_v54, %v735_v57 }
 0x24d   :  { %462 = sbr.rel (!%p459_p1) target bundleno = 234 (0xea), region = 82 }
 0x24e   : > { %v738_v60 = vadd.f32 %v737_v59, %v736_v58 }
 0x250   : > { %v746_v61 = vsel %vm745_vm3, %v738_v60, %v1127_v14  }
 0x251   : > { %v1450_v14 = vmov %v746_v61  ;;  %v1451_v13 = vmov (%p459_p1), %v746_v61 }
 0x252 PF:  { %v750_v62 = vld [vmem:[%s1438_s11 + $0x18] sm:$0xff]  ;;  %v1142_v63 = vmov 0.0   ;;  %v749_v0 = vld [vmem:[%s1438_s11 + $0x10] sm:$0xff]  ;;  %vm1143_vm4 = vmmov 0   ;;  %v748_v20 = vld [vmem:[%s1438_s11 + $0x8] sm:$0xff]  ;;  %vm831_vm5 = vcmask 31744   ;;  %v1135_v13 = vphi %v1364_v13, %v1451_v13  }
 0x253   :  { %1048 = vmatprep.subr.mxu0 %v1142_v63  ;;  %1056 = vmatprep.mubr.msk.f32.mxu0 %vm1143_vm4, %v1142_v63  ;;  %v747_v21 = vld [vmem:[%s1438_s11] sm:$0xff] }
 0x254   :  { %1049 = vmatpush3.msra.mxu0 %v750_v62  ;;  %v897_v22 = vld [vmem:[%s1439_s12] ss:$0 sm:$0xff] }
 0x255   :  { %1050 = vmatprep.subr.mxu0 %v1142_v63 }
 0x256   :  { %1051 = vmatpush3.msra.mxu0 %v749_v0 }
 0x257   :  { %1052 = vmatprep.subr.mxu0 %v1142_v63 }
 0x258   :  { %1053 = vmatpush3.msra.mxu0 %v748_v20 }
 0x259   :  { %1054 = vmatprep.subr.mxu0 %v1142_v63 }
 0x25a   :  { %1055 = vmatpush3.msra.mxu0 %v747_v21 }
 0x25b   :  { %1057 = vmatmul.mubr.msk.f32.vlgmr.msra.gmra.mxu0 %vm64_vm0, %v1135_v13 }
 0x31b   :  { %v827_v23 = vpop.f32.mrf.mxu0 }
 0x31c   :  { %v828_v24 = vadd.f32 %v897_v22, %v827_v23 }
 0x31d   :  { %v1058_v25 = vpop.f32.mrf.mxu0 }
 0x31e   :  { %v832_v1 = vsel %vm831_vm5, %v828_v24, -inf }
 0x31f   :  { %833 = vmax.xlane.f32.xlu0 %v832_v1 }
 0x3a8   :  { %v834_v2 = vpop.xlane.xlu0 %833 }
 0x3a9   :  { %v835_v3 = vsub.f32 %v828_v24, %v834_v2 }
 0x3ab   :  { %v836_v4 = vmul.f32 1.442695, %v835_v3 }
 0x3ad   :  { %1109 = vpow2.f32 %v836_v4 }
 0x3ba   :  { %v1110_v5 = vpop.eup %1109 }
 0x3bb   :  { %v838_v6 = vsel %vm831_vm5, %v1110_v5, 0.0 }
 0x3bc   :  { %839 = vadd.xlane.f32.xlu0 %v838_v6 }
 0x445   :  { %v840_v7 = vpop.xlane.xlu0 %839 }
 0x446   :  { %1111 = vrcp.f32 %v840_v7 }
 0x453   :  { %v1112_v8 = vpop.eup %1111 }
 0x454   :  { %v842_v9 = vmul.f32 %v1112_v8, %v1110_v5 }
 0x456   :  { %843 = vst.msk [vmem:[%s1440_s13] sm:$0xff] %vm831_vm5, %v842_v9 }

</bundles_post_ra>
